<compile_context>
chip_gen: v5e
topology: v5e:2x2
jax: 0.10.0
libtpu: 0.0.40
codegen_flags: <defaults>
</compile_context>

<pallas_src>
import math

import jax
import jax.numpy as jnp
from jax.experimental import pallas as pl
from jax.experimental.pallas import tpu as pltpu


def _mul_const_kernel(x_ref, c_ref, o_ref):
    # x_ref: (T, L) tile, c_ref: (1, L) constant row, o_ref: (T, L).
    # Implicit row broadcast in the multiply; pure vld -> vmul -> vst
    # (no explicit broadcast_in_dim inside the kernel).
    o_ref[...] = x_ref[...] * c_ref[...]


def _sublane_multiple(itemsize):
    # Packed sublanes per vreg: f32 -> 8, bf16/f16 -> 16, int8/fp8 -> 32.
    return 8 * max(1, 4 // max(1, itemsize))


def _pick_block_rows(rows, row_bytes, sublane,
                     target_bytes=3 << 20, big_bytes=4 << 20, min_steps=4):
    """Rows per VMEM block.

    - ~target_bytes per buffer: double-buffered x-in + out blocks (~12 MiB)
      fit under every generation's scoped-VMEM default (16/32/32 MiB) and
      v7x's 64 MiB physical VMEM, while staying near the HBM roofline.
    - aligned to the dtype's packed sublane count.
    - for large problems, capped so the grid has >= min_steps steps, letting
      dimension_semantics=("parallel",) shard rows across v7x's two TCs.
    - never requires rows % block_rows == 0; caller uses pl.cdiv for the grid
      and Pallas masks the ragged final block.
    """
    if rows <= sublane:
        return rows  # single full-extent block (always legal)
    max_rows = max(sublane,
                   (target_bytes // max(1, row_bytes)) // sublane * sublane)
    block_rows = min(rows, max_rows)
    if rows * row_bytes >= big_bytes:
        per_step = -(-rows // min_steps)                    # cdiv(rows, min_steps)
        per_step = -(-per_step // sublane) * sublane        # round up to sublane
        block_rows = min(block_rows, max(sublane, per_step))
    block_rows = max(sublane, (block_rows // sublane) * sublane)
    return min(block_rows, rows)


def mul_model_constant(x, constant):
    """x: (N, C, H, W), constant: (H, W) -> elementwise mul with broadcast."""
    N, C, H, W = x.shape
    assert constant.shape == (H, W)

    # Match torch.mul type promotion (e.g. bf16 x * f32 parameter -> f32 out).
    out_dtype = jnp.promote_types(x.dtype, constant.dtype)

    rows = N * C
    hw = H * W

    # Lane-dense folding: make the flattened last dim a multiple of 128 when
    # possible by grouping `fold` NCHW rows into one slab row and tiling the
    # constant `fold` times. For H*W already a multiple of 128, fold == 1.
    fold = 128 // math.gcd(hw, 128)
    if fold > 1 and rows % fold == 0:
        rows_f, hw_f = rows // fold, hw * fold
        c_row = jnp.tile(constant.reshape(-1), fold).reshape(1, hw_f)
    else:
        # TODO(synk): if hw % 128 != 0 here, the last dim stays full-extent and
        # stores are masked (vst.msk); acceptable but slower than lane-dense.
        fold = 1
        rows_f, hw_f = rows, hw
        c_row = constant.reshape(1, hw)

    x2d = x.reshape(rows_f, hw_f).astype(out_dtype)
    c_row = c_row.astype(out_dtype)

    itemsize = jnp.dtype(out_dtype).itemsize
    sublane = _sublane_multiple(itemsize)
    row_bytes = hw_f * itemsize
    block_rows = _pick_block_rows(rows_f, row_bytes, sublane)
    grid = (pl.cdiv(rows_f, block_rows),)

    nbytes = x2d.size * itemsize
    cost = pl.CostEstimate(
        flops=x2d.size,
        transcendentals=0,
        bytes_accessed=2 * nbytes + c_row.size * itemsize,
    )

    out2d = pl.pallas_call(
        _mul_const_kernel,
        out_shape=jax.ShapeDtypeStruct((rows_f, hw_f), out_dtype),
        grid=grid,
        in_specs=[
            pl.BlockSpec((block_rows, hw_f), lambda i: (i, 0)),
            pl.BlockSpec((1, hw_f), lambda i: (0, 0)),
        ],
        out_specs=pl.BlockSpec((block_rows, hw_f), lambda i: (i, 0)),
        compiler_params=pltpu.CompilerParams(
            dimension_semantics=("parallel",),
        ),
        cost_estimate=cost,
    )(x2d, c_row)

    return out2d.reshape(N, C, H, W)


if __name__ == "__main__":
    key = jax.random.PRNGKey(0)
    kx, kc = jax.random.split(key)
    N, C, H, W = 2, 4, 16, 16

    # Deterministic inputs. The module initializes its parameter to zeros, but
    # a zero constant makes the self-test vacuous; use a non-zero constant to
    # validate the broadcast multiply (forward semantics are identical).
    x = jax.random.normal(kx, (N, C, H, W), dtype=jnp.float32)
    constant = jax.random.normal(kc, (H, W), dtype=jnp.float32)

    out = jax.block_until_ready(mul_model_constant(x, constant))
    ref = x * constant
    assert out.shape == (N, C, H, W)
    assert jnp.allclose(out, ref), "mismatch vs reference"

    # Module's actual init (zero constant).
    out_zero = jax.block_until_ready(
        mul_model_constant(x, jnp.zeros((H, W), dtype=jnp.float32))
    )
    assert jnp.allclose(out_zero, jnp.zeros_like(x)), "zero-constant mismatch"

    # Ragged-rows path (grid = cdiv, masked final block): N*C = 15.
    xr = jax.random.normal(kx, (3, 5, 16, 16), dtype=jnp.float32)
    outr = jax.block_until_ready(mul_model_constant(xr, constant))
    assert jnp.allclose(outr, xr * constant), "ragged-rows mismatch"

    # Lane-dense folding path: H*W = 64 -> fold 2 rows into a 128-wide slab.
    cf = jax.random.normal(kc, (8, 8), dtype=jnp.float32)
    xf = jax.random.normal(kx, (2, 4, 8, 8), dtype=jnp.float32)
    outf = jax.block_until_ready(mul_model_constant(xf, cf))
    assert jnp.allclose(outf, xf * cf), "folded-lane mismatch"

    print("KERNEL_OK")
</pallas_src>

<mosaic_0001>
module attributes {stable_mosaic.version = 11 : i64} {
  func.func @_mul_const_kernel(%arg0: i32, %arg1: memref<8x256xf32, #tpu.memory_space<vmem>>, %arg2: memref<1x256xf32, #tpu.memory_space<vmem>>, %arg3: memref<8x256xf32, #tpu.memory_space<vmem>>) attributes {dimension_semantics = [#tpu.dimension_semantics<parallel>], iteration_bounds = array<i64: 1>, scalar_prefetch = 0 : i64, scratch_operands = 0 : i64, tpu.core_type = #tpu.core_type<tc>, window_params = [{transform_indices = @transform_0, window_bounds = array<i64: 8, 256>}, {pipeline_mode = #tpu.pipeline_mode<synchronous>, transform_indices = @transform_1, window_bounds = array<i64: 1, 256>}, {transform_indices = @transform_2, window_bounds = array<i64: 8, 256>}]} {
    %c0 = arith.constant 0 : index
    %c0_0 = arith.constant 0 : index
    %0 = vector.load %arg1[%c0, %c0_0] : memref<8x256xf32, #tpu.memory_space<vmem>>, vector<8x256xf32>
    %c0_1 = arith.constant 0 : index
    %c0_2 = arith.constant 0 : index
    %1 = vector.load %arg2[%c0_1, %c0_2] : memref<1x256xf32, #tpu.memory_space<vmem>>, vector<1x256xf32>
    %2 = vector.broadcast %1 : vector<1x256xf32> to vector<8x256xf32>
    %3 = arith.mulf %0, %2 : vector<8x256xf32>
    %c0_3 = arith.constant 0 : index
    %c0_4 = arith.constant 0 : index
    %4 = vector.load %arg3[%c0_3, %c0_4] : memref<8x256xf32, #tpu.memory_space<vmem>>, vector<8x256xf32>
    tpu.vector_store %arg3[%c0_3, %c0_4], %3 {strides = array<i32>} : memref<8x256xf32, #tpu.memory_space<vmem>>, vector<8x256xf32>,
    return
  }
  func.func @transform_0(%arg0: i32) -> (i32, i32) {
    %c0_i32 = arith.constant 0 : i32
    %c0_i32_0 = arith.constant 0 : i32
    return %arg0, %c0_i32 : i32, i32
  }
  func.func @transform_1(%arg0: i32) -> (i32, i32) {
    %c0_i32 = arith.constant 0 : i32
    %c0_i32_0 = arith.constant 0 : i32
    %c0_i32_1 = arith.constant 0 : i32
    return %c0_i32, %c0_i32_0 : i32, i32
  }
  func.func @transform_2(%arg0: i32) -> (i32, i32) {
    %c0_i32 = arith.constant 0 : i32
    %c0_i32_0 = arith.constant 0 : i32
    return %arg0, %c0_i32 : i32, i32
  }
}

</mosaic_0001>

<bundles_post_ra>
// kernel: tpu_custom_call.1
= control target key start
LH: loop header
LB: loop body
LE: loop exit
PB: predicated region body
PF: predicated region fallthrough
CT: control target
= control target key end

     0   :  { %7 = vsyncpa [#allocation3], 0  ;;  %s178_s0 = inlined_call_operand.hbm [shape: f32[8,256], index: 0, kind: input, shape index: {}]   ;;  %s179_s1 = inlined_call_operand.hbm [shape: f32[1,256], index: 1, kind: input, shape index: {}]   ;;  %s180_s2 = inlined_call_operand.hbm [shape: f32[8,256], index: 2, kind: output, shape index: {}]  }
   0x1   :  { %8 = vsyncpa [#allocation6], 0 }
   0x2   :  { %9 = vsyncpa [#allocation4], 0  ;;  %s15_s11 = sshll.u32 %s178_s0, 4  ;;  %s151_s12 = smov [#allocation2]   ;;  %s16_s11 = int_to_ptr.hbm [resolvable:$true] %s15_s11 }
   0x3   :  { %s17_s13 = sshll.u32 %s151_s12, 4  ;;  %s26_s16 = sshll.u32 %s179_s1, 4  ;;  %s18_s13 = int_to_ptr.vmem [resolvable:$true] %s17_s13  ;;  %s27_s16 = int_to_ptr.hbm [resolvable:$true] %s26_s16 }
   0x4   :  { %20 = dma.hbm_to_vmem [thread:$0]  %s16_s11, 256, %s18_s13, [#allocation3]  }
   0x5   :  { %s152_s17 = smov [#allocation5]  }
   0x6   :  { %s28_s18 = sshll.u32 %s152_s17, 4  ;;  %s29_s18 = int_to_ptr.vmem [resolvable:$true] %s28_s18 }
   0x7   :  { %31 = dma.hbm_to_vmem [thread:$0]  %s27_s16, 32, %s29_s18, [#allocation6]  }
   0x8   :  { %145 = dma.done.wait [#allocation3], 256  }
   0x9   :  { %146 = vsyncadd [#allocation3], 4294967040 }
   0xa   :  { %147 = dma.done.wait [#allocation6], 32  }
   0xb   :  { %148 = vsyncadd [#allocation6], 4294967264  ;;  %v40_v0 = vld [vmem:[#allocation2] sm:$0xff]  ;;  %v42_v1 = vld [vmem:[#allocation5] sm:$0x3]  ;;  %s153_s0 = smov [#allocation7]  }
   0xc   :  { %v41_v2 = vld [vmem:[#allocation2 + $0x8] sm:$0xff]  ;;  %v44_v3 = vperm.slane %v42_v1, 0  ;;  %v45_v4 = vperm.slane %v42_v1, 1  ;;  %s57_s19 = sshll.u32 %s153_s0, 4  ;;  %s59_s1 = sshll.u32 %s180_s2, 4  ;;  %s58_s19 = int_to_ptr.vmem [resolvable:$true] %s57_s19  ;;  %s60_s1 = int_to_ptr.hbm [resolvable:$true] %s59_s1 }
   0xe   :  { %v48_v5 = vmul.f32 %v44_v3, %v40_v0  ;;  %v49_v6 = vmul.f32 %v45_v4, %v41_v2 }
  0x10   :  { %50 = vst [vmem:[#allocation7] sm:$0xff] %v48_v5 }
  0x11   :  { %51 = vst [vmem:[#allocation7 + $0x8] sm:$0xff] %v49_v6 }
  0x12   :  { %62 = dma.vmem_to_hbm [thread:$0]  %s58_s19, 256, %s60_s1, [#allocation4]  }
  0x13   :  { %149 = dma.done.wait [#allocation4], 256  }
  0x14   :  { %150 = vsyncadd [#allocation4], 4294967040 }
  0x15   :  { %67 = vsyncpa [#allocation3], 1 }
  0x16   :  { %68 = vsyncpa [#allocation6], 1 }
  0x17   :  { %69 = vsyncpa [#allocation4], 1 }

</bundles_post_ra>
